<compile_context>
chip_gen: v7x
topology: tpu7x:2x2x1
jax: 0.10.0
libtpu: 0.0.40
codegen_flags: <defaults>
</compile_context>

<pallas_src>
import functools

import jax
import jax.numpy as jnp
from jax import lax
from jax.experimental import pallas as pl
from jax.experimental.pallas import tpu as pltpu

_LANES = 128
_MAX_CHUNK = 512  # lanes per inner chunk -> (32, 512) f32 intermediates = 16 vregs


def _round_up(x, m):
    return ((x + m - 1) // m) * m


def _cdiv(a, b):
    return -(-a // b)


def _policy_mlp_kernel(x_ref, w1_ref, b1_ref, w2_ref, b2_ref, w3_ref, b3_ref,
                       w4_ref, b4_ref, o_ref, *, chunk, n_chunks, compute_dtype):
    # Weights are VMEM-resident across grid steps. Layer-1 stays f32 (K=4 is
    # trivially cheap); layers 2-4 optionally use bf16 operands. Biases, tanh
    # and all accumulation stay f32 (v5e has no bf16 VPU/EUP).
    w1 = w1_ref[...]                          # (H, S) f32
    b1 = b1_ref[...]                          # (H, 1) f32
    w2 = w2_ref[...].astype(compute_dtype)    # (H, H)
    b2 = b2_ref[...]
    w3 = w3_ref[...].astype(compute_dtype)    # (H, H)
    b3 = b3_ref[...]
    w4 = w4_ref[...].astype(compute_dtype)    # (A, H)
    b4 = b4_ref[...]                          # (A, 1)

    def body(c, carry):
        off = c * chunk
        x = x_ref[pl.ds(off, chunk), :]       # (chunk, S) batch-major slab
        # Layer 1: contract x's last axis -> feature-major (H, chunk); the
        # reorientation rides the MXU/XLU path instead of a wrapper transpose.
        h = lax.dot_general(w1, x, (((1,), (1,)), ((), ())),
                            preferred_element_type=jnp.float32) + b1
        h = jnp.tanh(h).astype(compute_dtype)
        h = jnp.tanh(jnp.dot(w2, h, preferred_element_type=jnp.float32) + b2)
        h = h.astype(compute_dtype)
        h = jnp.tanh(jnp.dot(w3, h, preferred_element_type=jnp.float32) + b3)
        h = h.astype(compute_dtype)
        out = jnp.dot(w4, h, preferred_element_type=jnp.float32) + b4
        # Lane-dense store: batch sits on the lane axis of the output.
        o_ref[:, pl.ds(off, chunk)] = out.astype(o_ref.dtype)
        return carry

    lax.fori_loop(0, n_chunks, body, 0, unroll=True)


@functools.partial(jax.jit, static_argnames=("tb", "compute_dtype"))
def policy_network_forward(states, w1, b1, w2, b2, w3, b3, w4, b4, *,
                           tb=1024, compute_dtype=jnp.bfloat16):
    """Pallas forward for PolicyNetworkBase.net.

    states: (B, state_dim) f32 (passed untransposed, unpadded)
    wN: (out_features, in_features) f32 (PyTorch orientation)
    bN: (out_features, 1) f32
    returns: (B, action_dim) f32
    """
    B, state_dim = states.shape
    hidden_dim = w1.shape[0]
    action_dim = w4.shape[0]

    # --- batch tiling --------------------------------------------------------
    tb_cap = max(_LANES, _round_up(tb, _LANES))
    n_tiles = _cdiv(B, tb_cap)
    if B > _LANES:
        n_tiles = max(n_tiles, 2)                    # keep both v7x TCs busy
    tb_eff = _round_up(_cdiv(B, n_tiles), _LANES)    # balanced tiles, no ~2x pad
    if tb_eff > _MAX_CHUNK:
        tb_eff = _round_up(tb_eff, _MAX_CHUNK)       # whole number of chunks
    chunk = min(tb_eff, _MAX_CHUNK)
    n_chunks = tb_eff // chunk
    n_tiles = _cdiv(B, tb_eff)                       # last block partial -> masked
    grid = (n_tiles,)

    resident = lambda arr: pl.BlockSpec(arr.shape, lambda i: (0, 0))

    flops = 2 * B * (state_dim * hidden_dim
                     + 2 * hidden_dim * hidden_dim
                     + hidden_dim * action_dim)
    transcendentals = 3 * B * hidden_dim
    bytes_accessed = 4 * (B * state_dim + B * action_dim
                          + w1.size + w2.size + w3.size + w4.size
                          + b1.size + b2.size + b3.size + b4.size)

    kernel = functools.partial(_policy_mlp_kernel, chunk=chunk,
                               n_chunks=n_chunks, compute_dtype=compute_dtype)

    out_t = pl.pallas_call(
        kernel,
        out_shape=jax.ShapeDtypeStruct((action_dim, B), jnp.float32),
        grid=grid,
        in_specs=[
            pl.BlockSpec((tb_eff, state_dim), lambda i: (i, 0)),   # states tile
            resident(w1), resident(b1),
            resident(w2), resident(b2),
            resident(w3), resident(b3),
            resident(w4), resident(b4),
        ],
        out_specs=pl.BlockSpec((action_dim, tb_eff), lambda i: (0, i)),
        compiler_params=pltpu.CompilerParams(
            dimension_semantics=("parallel",),
            vmem_limit_bytes=32 * 1024 * 1024),
        cost_estimate=pl.CostEstimate(
            flops=flops,
            transcendentals=transcendentals,
            bytes_accessed=bytes_accessed),
    )(states, w1, b1, w2, b2, w3, b3, w4, b4)

    return out_t.T                                   # (B, action_dim), tiny reorder


def init_policy_network_params(key, state_dim, action_dim, hidden_dim=32):
    """PyTorch nn.Linear default init (uniform +-1/sqrt(fan_in)).

    Weights are (out_features, in_features); biases are (out_features, 1)."""
    def linear_init(k, fan_in, fan_out):
        kw, kb = jax.random.split(k)
        bound = 1.0 / jnp.sqrt(jnp.float32(fan_in))
        w = jax.random.uniform(kw, (fan_out, fan_in), jnp.float32, -bound, bound)
        b = jax.random.uniform(kb, (fan_out, 1), jnp.float32, -bound, bound)
        return w, b

    k1, k2, k3, k4 = jax.random.split(key, 4)
    w1, b1 = linear_init(k1, state_dim, hidden_dim)
    w2, b2 = linear_init(k2, hidden_dim, hidden_dim)
    w3, b3 = linear_init(k3, hidden_dim, hidden_dim)
    w4, b4 = linear_init(k4, hidden_dim, action_dim)
    return w1, b1, w2, b2, w3, b3, w4, b4


def _reference_forward(states, w1, b1, w2, b2, w3, b3, w4, b4):
    h1 = jnp.tanh(states @ w1.T + b1.T)
    h2 = jnp.tanh(h1 @ w2.T + b2.T)
    h3 = jnp.tanh(h2 @ w3.T + b3.T)
    return h3 @ w4.T + b4.T


if __name__ == "__main__":
    key = jax.random.PRNGKey(0)
    k_params, k_states, k_ragged = jax.random.split(key, 3)

    batch, state_dim, action_dim, hidden_dim = 256, 4, 2, 32
    params = init_policy_network_params(k_params, state_dim, action_dim, hidden_dim)
    states = jax.random.normal(k_states, (batch, state_dim), jnp.float32)
    ref = _reference_forward(states, *params)

    # Full-f32 path: tight tolerance.
    out_f32 = jax.block_until_ready(
        policy_network_forward(states, *params, tb=1024, compute_dtype=jnp.float32))
    assert out_f32.shape == (batch, action_dim), out_f32.shape
    assert jnp.allclose(out_f32, ref, atol=1e-4, rtol=1e-4)

    # Default path (bf16 operands for layers 2-4, f32 tanh/accum): relaxed tol.
    out_bf16 = jax.block_until_ready(policy_network_forward(states, *params))
    assert out_bf16.shape == (batch, action_dim), out_bf16.shape
    assert jnp.allclose(out_bf16, ref, atol=3e-2, rtol=3e-2)

    # Ragged batch exercises the partial (masked) final block - no wrapper pad.
    ragged = jax.random.normal(k_ragged, (200, state_dim), jnp.float32)
    out_ragged = jax.block_until_ready(
        policy_network_forward(ragged, *params, compute_dtype=jnp.float32))
    assert out_ragged.shape == (200, action_dim), out_ragged.shape
    assert jnp.allclose(out_ragged, _reference_forward(ragged, *params),
                        atol=1e-4, rtol=1e-4)

    print("KERNEL_OK")
</pallas_src>

<mosaic_0001>
module attributes {stable_mosaic.version = 11 : i64} {
  func.func @_policy_mlp_kernel(%arg0: i32, %arg1: memref<128x4xf32, #tpu.memory_space<vmem>>, %arg2: memref<32x4xf32, #tpu.memory_space<vmem>>, %arg3: memref<32x1xf32, #tpu.memory_space<vmem>>, %arg4: memref<32x32xf32, #tpu.memory_space<vmem>>, %arg5: memref<32x1xf32, #tpu.memory_space<vmem>>, %arg6: memref<32x32xf32, #tpu.memory_space<vmem>>, %arg7: memref<32x1xf32, #tpu.memory_space<vmem>>, %arg8: memref<2x32xf32, #tpu.memory_space<vmem>>, %arg9: memref<2x1xf32, #tpu.memory_space<vmem>>, %arg10: memref<2x128xf32, #tpu.memory_space<vmem>>) attributes {dimension_semantics = [#tpu.dimension_semantics<parallel>], iteration_bounds = array<i64: 2>, scalar_prefetch = 0 : i64, scratch_operands = 0 : i64, tpu.core_type = #tpu.core_type<tc>, window_params = [{transform_indices = @transform_0, window_bounds = array<i64: 128, 4>}, {pipeline_mode = #tpu.pipeline_mode<synchronous>, transform_indices = @transform_1, window_bounds = array<i64: 32, 4>}, {pipeline_mode = #tpu.pipeline_mode<synchronous>, transform_indices = @transform_2, window_bounds = array<i64: 32, 1>}, {pipeline_mode = #tpu.pipeline_mode<synchronous>, transform_indices = @transform_3, window_bounds = array<i64: 32, 32>}, {pipeline_mode = #tpu.pipeline_mode<synchronous>, transform_indices = @transform_4, window_bounds = array<i64: 32, 1>}, {pipeline_mode = #tpu.pipeline_mode<synchronous>, transform_indices = @transform_5, window_bounds = array<i64: 32, 32>}, {pipeline_mode = #tpu.pipeline_mode<synchronous>, transform_indices = @transform_6, window_bounds = array<i64: 32, 1>}, {pipeline_mode = #tpu.pipeline_mode<synchronous>, transform_indices = @transform_7, window_bounds = array<i64: 2, 32>}, {pipeline_mode = #tpu.pipeline_mode<synchronous>, transform_indices = @transform_8, window_bounds = array<i64: 2, 1>}, {transform_indices = @transform_9, window_bounds = array<i64: 2, 128>}]} {
    %c0 = arith.constant 0 : index
    %c0_0 = arith.constant 0 : index
    %0 = vector.load %arg2[%c0, %c0_0] : memref<32x4xf32, #tpu.memory_space<vmem>>, vector<32x4xf32>
    %c0_1 = arith.constant 0 : index
    %c0_2 = arith.constant 0 : index
    %1 = vector.load %arg3[%c0_1, %c0_2] : memref<32x1xf32, #tpu.memory_space<vmem>>, vector<32x1xf32>
    %c0_3 = arith.constant 0 : index
    %c0_4 = arith.constant 0 : index
    %2 = vector.load %arg4[%c0_3, %c0_4] : memref<32x32xf32, #tpu.memory_space<vmem>>, vector<32x32xf32>
    %c0_5 = arith.constant 0 : index
    %c0_6 = arith.constant 0 : index
    %3 = vector.load %arg5[%c0_5, %c0_6] : memref<32x1xf32, #tpu.memory_space<vmem>>, vector<32x1xf32>
    %c0_7 = arith.constant 0 : index
    %c0_8 = arith.constant 0 : index
    %4 = vector.load %arg6[%c0_7, %c0_8] : memref<32x32xf32, #tpu.memory_space<vmem>>, vector<32x32xf32>
    %c0_9 = arith.constant 0 : index
    %c0_10 = arith.constant 0 : index
    %5 = vector.load %arg7[%c0_9, %c0_10] : memref<32x1xf32, #tpu.memory_space<vmem>>, vector<32x1xf32>
    %c0_11 = arith.constant 0 : index
    %c0_12 = arith.constant 0 : index
    %6 = vector.load %arg8[%c0_11, %c0_12] : memref<2x32xf32, #tpu.memory_space<vmem>>, vector<2x32xf32>
    %c0_13 = arith.constant 0 : index
    %c0_14 = arith.constant 0 : index
    %7 = vector.load %arg9[%c0_13, %c0_14] : memref<2x1xf32, #tpu.memory_space<vmem>>, vector<2x1xf32>
    %c0_i32 = arith.constant 0 : i32
    %c128_i32 = arith.constant 128 : i32
    %8 = arith.muli %c0_i32, %c128_i32 : i32
    %9 = arith.index_cast %8 : i32 to index
    %c0_15 = arith.constant 0 : index
    %10 = vector.load %arg1[%9, %c0_15] : memref<128x4xf32, #tpu.memory_space<vmem>>, vector<128x4xf32>
    %cst = arith.constant dense<0.000000e+00> : vector<32x128xf32>
    %11 = tpu.matmul %0, %10, %cst {dimension_numbers = #tpu.dot_dimension_numbers<[1], [1], [0], [0], [0, 0, 1, 0], [], []>} : vector<32x4xf32>, vector<128x4xf32>, vector<32x128xf32> -> vector<32x128xf32>
    %12 = vector.broadcast %1 : vector<32x1xf32> to vector<32x128xf32>
    %13 = arith.addf %11, %12 : vector<32x128xf32>
    %14 = math.tanh %13 : vector<32x128xf32>
    %cst_16 = arith.constant dense<0.000000e+00> : vector<32x128xf32>
    %15 = tpu.matmul %2, %14, %cst_16 {dimension_numbers = #tpu.dot_dimension_numbers<[1], [0], [0], [1], [0, 0, 1, 1], [], []>} : vector<32x32xf32>, vector<32x128xf32>, vector<32x128xf32> -> vector<32x128xf32>
    %16 = vector.broadcast %3 : vector<32x1xf32> to vector<32x128xf32>
    %17 = arith.addf %15, %16 : vector<32x128xf32>
    %18 = math.tanh %17 : vector<32x128xf32>
    %cst_17 = arith.constant dense<0.000000e+00> : vector<32x128xf32>
    %19 = tpu.matmul %4, %18, %cst_17 {dimension_numbers = #tpu.dot_dimension_numbers<[1], [0], [0], [1], [0, 0, 1, 1], [], []>} : vector<32x32xf32>, vector<32x128xf32>, vector<32x128xf32> -> vector<32x128xf32>
    %20 = vector.broadcast %5 : vector<32x1xf32> to vector<32x128xf32>
    %21 = arith.addf %19, %20 : vector<32x128xf32>
    %22 = math.tanh %21 : vector<32x128xf32>
    %cst_18 = arith.constant dense<0.000000e+00> : vector<2x128xf32>
    %23 = tpu.matmul %6, %22, %cst_18 {dimension_numbers = #tpu.dot_dimension_numbers<[1], [0], [0], [1], [0, 0, 1, 1], [], []>} : vector<2x32xf32>, vector<32x128xf32>, vector<2x128xf32> -> vector<2x128xf32>
    %24 = vector.broadcast %7 : vector<2x1xf32> to vector<2x128xf32>
    %25 = arith.addf %23, %24 : vector<2x128xf32>
    %c0_19 = arith.constant 0 : index
    %26 = arith.index_cast %8 : i32 to index
    %27 = vector.load %arg10[%c0_19, %26] : memref<2x128xf32, #tpu.memory_space<vmem>>, vector<2x128xf32>
    tpu.vector_store %arg10[%c0_19, %26], %25 {strides = array<i32>} : memref<2x128xf32, #tpu.memory_space<vmem>>, vector<2x128xf32>,
    %c1_i32 = arith.constant 1 : i32
    return
  }
  func.func @transform_0(%arg0: i32) -> (i32, i32) {
    %c0_i32 = arith.constant 0 : i32
    %c0_i32_0 = arith.constant 0 : i32
    return %arg0, %c0_i32 : i32, i32
  }
  func.func @transform_1(%arg0: i32) -> (i32, i32) {
    %c0_i32 = arith.constant 0 : i32
    %c0_i32_0 = arith.constant 0 : i32
    %c0_i32_1 = arith.constant 0 : i32
    return %c0_i32, %c0_i32_0 : i32, i32
  }
  func.func @transform_2(%arg0: i32) -> (i32, i32) {
    %c0_i32 = arith.constant 0 : i32
    %c0_i32_0 = arith.constant 0 : i32
    %c0_i32_1 = arith.constant 0 : i32
    return %c0_i32, %c0_i32_0 : i32, i32
  }
  func.func @transform_3(%arg0: i32) -> (i32, i32) {
    %c0_i32 = arith.constant 0 : i32
    %c0_i32_0 = arith.constant 0 : i32
    %c0_i32_1 = arith.constant 0 : i32
    return %c0_i32, %c0_i32_0 : i32, i32
  }
  func.func @transform_4(%arg0: i32) -> (i32, i32) {
    %c0_i32 = arith.constant 0 : i32
    %c0_i32_0 = arith.constant 0 : i32
    %c0_i32_1 = arith.constant 0 : i32
    return %c0_i32, %c0_i32_0 : i32, i32
  }
  func.func @transform_5(%arg0: i32) -> (i32, i32) {
    %c0_i32 = arith.constant 0 : i32
    %c0_i32_0 = arith.constant 0 : i32
    %c0_i32_1 = arith.constant 0 : i32
    return %c0_i32, %c0_i32_0 : i32, i32
  }
  func.func @transform_6(%arg0: i32) -> (i32, i32) {
    %c0_i32 = arith.constant 0 : i32
    %c0_i32_0 = arith.constant 0 : i32
    %c0_i32_1 = arith.constant 0 : i32
    return %c0_i32, %c0_i32_0 : i32, i32
  }
  func.func @transform_7(%arg0: i32) -> (i32, i32) {
    %c0_i32 = arith.constant 0 : i32
    %c0_i32_0 = arith.constant 0 : i32
    %c0_i32_1 = arith.constant 0 : i32
    return %c0_i32, %c0_i32_0 : i32, i32
  }
  func.func @transform_8(%arg0: i32) -> (i32, i32) {
    %c0_i32 = arith.constant 0 : i32
    %c0_i32_0 = arith.constant 0 : i32
    %c0_i32_1 = arith.constant 0 : i32
    return %c0_i32, %c0_i32_0 : i32, i32
  }
  func.func @transform_9(%arg0: i32) -> (i32, i32) {
    %c0_i32 = arith.constant 0 : i32
    %c0_i32_0 = arith.constant 0 : i32
    return %c0_i32, %arg0 : i32, i32
  }
}

</mosaic_0001>

<bundles_post_ra>
// kernel: policy_network_forward.1
= control target key start
LH: loop header
LB: loop body
LE: loop exit
PB: predicated region body
PF: predicated region fallthrough
CT: control target
= control target key end

     0   :  { %14 = vsyncpa [#allocation3], 0  ;;  %s1602_s0 = inlined_call_operand.vmem [shape: f32[256,4], index: 0, kind: input, shape index: {}]   ;;  %s1603_s1 = inlined_call_operand.vmem [shape: f32[32,4], index: 1, kind: input, shape index: {}]   ;;  %s1604_s2 = inlined_call_operand.vmem [shape: f32[32,1], index: 2, kind: input, shape index: {}]   ;;  %s1605_s3 = inlined_call_operand.vmem [shape: f32[32,32], index: 3, kind: input, shape index: {}]   ;;  %s1606_s4 = inlined_call_operand.vmem [shape: f32[32,1], index: 4, kind: input, shape index: {}]   ;;  %s1607_s5 = inlined_call_operand.vmem [shape: f32[32,32], index: 5, kind: input, shape index: {}]   ;;  %s1608_s6 = inlined_call_operand.vmem [shape: f32[32,1], index: 6, kind: input, shape index: {}]   ;;  %s1609_s7 = inlined_call_operand.vmem [shape: f32[2,32], index: 7, kind: input, shape index: {}]   ;;  %s1610_s8 = inlined_call_operand.vmem [shape: f32[2,1], index: 8, kind: input, shape index: {}]   ;;  %s1611_s9 = inlined_call_operand.hbm [shape: f32[2,256], index: 9, kind: output, shape index: {}]  }
   0x1   :  { %16 = vsyncpa [#allocation3 + $0x1], 0  ;;  %s1356_s30 = smov 0   ;;  %s1358_s10 = smov 0  }
   0x2   :  { %s1360_s11 = smov 0   ;;  %s1362_s12 = smov 0  }
   0x3 LB: > { %s1377_s13 = sadd.s32 4294967295, %s1299_s12   ;;  %s940_s14 = sadd.s32 4294967294, %s1299_s12   ;;  %s1299_s12 = sphi %s1362_s12, %s1619_s12   ;;  %s1295_s11 = sphi %s1360_s11, %s1618_s11   ;;  %s1291_s10 = sphi %s1358_s10, %s1617_s10   ;;  %s1287_s30 = sphi %s1356_s30, %s1616_s30  }
   0x4   : > { %s1381_s15 = sadd.s32 1, %s1299_s12   ;;  %s223_s16 = sadd.s32 1, %s1295_s11 }
   0x5   : > { %s220_s17 = ssub.s32 %s1299_s12, %s1381_s15  ;;  %p233_p0 = scmp.ne.s32.totalorder %s1295_s11, %s1291_s10 }
   0x6   : > { %p221_p1 = scmp.eq.s32.totalorder %s220_s17, 0  ;;  %p234_p2 = scmp.eq.s32.totalorder %s1377_s13, 1 }
   0x7   : > { %p239_p3 = scmp.ne.s32.totalorder %s1291_s10, %s1287_s30  ;;  %p240_p4 = scmp.eq.s32.totalorder %s940_s14, 1 }
   0x8   : > { %s1392_s18 = scalar_select %p221_p1, %s1295_s11, %s223_s16  }
   0x9   : > { %p1394_p5 = por %p234_p2, %p233_p0  ;;  %p1398_p6 = por %p240_p4, %p239_p3 }
   0xa   : > { %p943_p7 = scmp.ge.s32.totalorder %s1299_s12, 1  ;;  %p291_p8 = scmp.lt.s32.totalorder %s1299_s12, 3 }
   0xc   : > { %p292_p9 = pnand %p943_p7, %p291_p8 }
   0xd   : > { %s945_s21 = sshll.u32 (!%p292_p9), %s1377_s13, 4  ;;  %vm395_vm0 = vcmask (!%p292_p9), 31744   ;;  %v333_v0 = vld [vmem:[%s1603_s1] sm:$0xff] (!%p292_p9)  ;;  %v1301_v1 = vmov (!%p292_p9), 0   ;;  %v339_v3 = vld [vmem:[%s1604_s2 + $0x10] sm:$0xff] (!%p292_p9)  ;;  %v338_v4 = vld [vmem:[%s1604_s2 + $0x8] sm:$0xff] (!%p292_p9) }
   0xe   : > { %295 = sbr.rel (%p292_p9) target bundleno = 1026 (0x402), region = 56  ;;  %p328_p10 = scmp.lt.s32.totalorder (!%p292_p9), %s945_s21, 31  ;;  %1053 = vmatprep.mubr.msk.f32.mxu0 (!%p292_p9), %vm395_vm0, %v333_v0  ;;  %1211 = vset.pattern.permute.xlu0 (!%p292_p9), %v1301_v1  ;;  %v337_v2 = vld [vmem:[%s1604_s2] sm:$0xff] (!%p292_p9)  ;;  %v340_v5 = vld [vmem:[%s1604_s2 + $0x18] sm:$0xff] (!%p292_p9)  ;;  %vm1428_vm1 = vmpackc.low (!%p292_p9), %vm395_vm0, %vm395_vm0  ;;  %vm565_vm2 = vcmask (!%p292_p9), 261120   ;;  %vm1303_vm3 = vmmov (!%p292_p9), 0  }
   0xf   : > { %377 = vperm.xlu0 (!%p292_p9), %1211, %v337_v2   ;;  %1212 = vset.pattern.permute.xlu1 (!%p292_p9), %v1301_v1  ;;  %v345_v7 = vld [vmem:[%s1606_s4] sm:$0xff] (!%p292_p9)  ;;  %v346_v13 = vld [vmem:[%s1606_s4 + $0x8] sm:$0xff] (!%p292_p9)  ;;  %v347_v15 = vld [vmem:[%s1606_s4 + $0x10] sm:$0xff] (!%p292_p9)  ;;  %s324_s16 = sand.u32 (!%p292_p9), 1, %s1291_s10   ;;  %s977_s22 = sshll.u32 (!%p292_p9), %s1377_s13, 5 }
  0x10   : > { %387 = vperm.xlu1 (!%p292_p9), %1212, %v339_v3   ;;  %v348_v16 = vld [vmem:[%s1606_s4 + $0x18] sm:$0xff] (!%p292_p9)  ;;  %v353_v19 = vld [vmem:[%s1608_s6] sm:$0xff] (!%p292_p9)  ;;  %v354_v21 = vld [vmem:[%s1608_s6 + $0x8] sm:$0xff] (!%p292_p9)  ;;  %s868_s27 = scalar_lea.sflag (!%p292_p9), [#allocation3], %s324_s16  ;;  %s1305_s13 = smov (!%p292_p9), [#allocation2]  }
  0x11   : > { %v355_v22 = vld [vmem:[%s1608_s6 + $0x10] sm:$0xff] (!%p292_p9)  ;;  %v356_v23 = vld [vmem:[%s1608_s6 + $0x18] sm:$0xff] (!%p292_p9)  ;;  %v358_v26 = vld [vmem:[%s1610_s8] sm:$0x3] (!%p292_p9)  ;;  %s1241_s29 = sshll.u32 (!%p292_p9), %s1305_s13, 4  ;;  %s1242_s29 = int_to_ptr.vmem [resolvable:$false] %s1241_s29 }
  0x12   : > { %v334_v40 = vld [vmem:[%s1603_s1 + $0x8] sm:$0xff] (!%p292_p9)  ;;  %v335_v41 = vld [vmem:[%s1603_s1 + $0x10] sm:$0xff] (!%p292_p9)  ;;  %v336_v42 = vld [vmem:[%s1603_s1 + $0x18] sm:$0xff] (!%p292_p9)  ;;  %s1243_s14 = scalar_lea.vmem (!%p292_p9), %s1242_s29, 64 }
  0x13   : > { %382 = vperm.xlu0 (!%p292_p9), %1211, %v338_v4   ;;  %v341_v43 = vld [vmem:[%s1605_s3] sm:$0xff] (!%p292_p9)  ;;  %v342_v62 = vld [vmem:[%s1605_s3 + $0x8] sm:$0xff] (!%p292_p9)  ;;  %v343_v63 = vld [vmem:[%s1605_s3 + $0x10] sm:$0xff] (!%p292_p9) }
  0x14   : > { %392 = vperm.xlu1 (!%p292_p9), %1212, %v340_v5   ;;  %1067 = vmatprep.mubr.msk.f32.mxu1 (!%p292_p9), %vm565_vm2, %v341_v43  ;;  %v344_v0 = vld [vmem:[%s1605_s3 + $0x18] sm:$0xff] (!%p292_p9)  ;;  %v349_v1 = vld [vmem:[%s1607_s5] sm:$0xff] (!%p292_p9) }
  0x15   : > { %s1621_s21 = smov (!%p328_p10, %s945_s21), 31  ;;  %v357_v43 = vld [vmem:[%s1609_s7] sm:$0x3] }
  0x16   : > { %s946_s17 = sshll.u32 %s1621_s21, 3  ;;  %s1560_s21 = scalar_lea.hbm %s1611_s9, %s977_s22 }
  0x17   : > { %s1424_s24 = scalar_lea.vmem %s1602_s0, %s946_s17  ;;  %547 = vperm.xlu0 %1211, %v345_v7   ;;  %s944_s17 = sshll.u32 %s324_s16, 1 }
  0x18   : > { %v359_v8 = vld [vmem:[%s1424_s24] sm:$0xff]  ;;  %v360_v9 = vld [vmem:[%s1424_s24 + $0x8] sm:$0xff]  ;;  %v361_v10 = vld [vmem:[%s1424_s24 + $0x10] sm:$0xff]  ;;  %552 = vperm.xlu1 %1212, %v346_v13   ;;  %s326_s23 = scalar_lea.vmem [#allocation2], %s944_s17 }
  0x19   : > { %v1098_v11 = vpack.c.bf16 %v360_v9, %v359_v8  ;;  %v362_v12 = vld [vmem:[%s1424_s24 + $0x18] sm:$0xff]  ;;  %v363_v17 = vld [vmem:[%s1424_s24 + $0x20] sm:$0xff]  ;;  %v364_v18 = vld [vmem:[%s1424_s24 + $0x28] sm:$0xff] }
  0x1a   : > { %v1104_v14 = vpack.c.bf16 %v362_v12, %v361_v10  ;;  %v1110_v20 = vpack.c.bf16 %v364_v18, %v363_v17  ;;  %v365_v24 = vld [vmem:[%s1424_s24 + $0x30] sm:$0xff]  ;;  %v366_v25 = vld [vmem:[%s1424_s24 + $0x38] sm:$0xff]  ;;  %v367_v28 = vld [vmem:[%s1424_s24 + $0x40] sm:$0xff] }
  0x1b   : > { %1100 = vmatprep.subr.msk.bf16.mxu0 %vm1428_vm1, %v1098_v11  ;;  %557 = vperm.xlu0 %1211, %v347_v15   ;;  %v1116_v27 = vpack.c.bf16 %v366_v25, %v365_v24  ;;  %v368_v29 = vld [vmem:[%s1424_s24 + $0x48] sm:$0xff]  ;;  %v369_v31 = vld [vmem:[%s1424_s24 + $0x50] sm:$0xff]  ;;  %v370_v32 = vld [vmem:[%s1424_s24 + $0x58] sm:$0xff]  ;;  %v1304_v24 = vmov 0.0  }
  0x1c   : > { %1103 = vmatpush3.bf16.xpose.msk.msra.mxu0 %vm1428_vm1, %v1098_v11  ;;  %562 = vperm.xlu1 %1212, %v348_v16   ;;  %v1122_v30 = vpack.c.bf16 %v368_v29, %v367_v28  ;;  %v1128_v33 = vpack.c.bf16 %v370_v32, %v369_v31  ;;  %v371_v34 = vld [vmem:[%s1424_s24 + $0x60] sm:$0xff]  ;;  %v372_v35 = vld [vmem:[%s1424_s24 + $0x68] sm:$0xff]  ;;  %v373_v37 = vld [vmem:[%s1424_s24 + $0x70] sm:$0xff] }
  0x1d   : > { %1106 = vmatprep.subr.msk.bf16.mxu0 %vm1428_vm1, %v1104_v14  ;;  %v1134_v36 = vpack.c.bf16 %v372_v35, %v371_v34  ;;  %v374_v38 = vld [vmem:[%s1424_s24 + $0x78] sm:$0xff]  ;;  %s881_s24 = sshll.u32 %s326_s23, 4  ;;  %s1562_s24 = int_to_ptr.vmem [resolvable:$true] %s881_s24 }
  0x1e   : > { %v1140_v39 = vpack.c.bf16 %v374_v38, %v373_v37  ;;  %s1237_s28 = scalar_lea.vmem %s1562_s24, 32  ;;  %p1244_p0 = scmp.lt.s32.totalorder %s1562_s24, %s1242_s29 }
  0x1f   : > { %669 = vperm.xlu0 %1211, %v353_v19   ;;  %p1238_p11 = scmp.ne.s32.totalorder %s1562_s24, %s1237_s28  ;;  %p1245_p1 = scmp.lt.s32.totalorder %s1243_s14, %s1237_s28 }
  0x20   : > { %674 = vperm.xlu1 %1212, %v354_v21   ;;  %v351_v21 = vld [vmem:[%s1607_s5 + $0x10] sm:$0xff] }
  0x21   : > { %p1239_p12 = pnand %p1238_p11, %p1394_p5  ;;  %p1246_p2 = por %p1245_p1, %p1244_p0 }
  0x23   : > { %679 = vperm.xlu0 %1211, %v355_v22   ;;  %v352_v22 = vld [vmem:[%s1607_s5 + $0x18] sm:$0xff]  ;;  %p1240_p13 = pneg %p1239_p12 }
  0x24   : > { %1109 = vmatpush3.bf16.xpose.msk.msra.mxu0 %vm1428_vm1, %v1104_v14  ;;  %684 = vperm.xlu1 %1212, %v356_v23   ;;  %v1302_v23 = vmov 0.0|0.0  }
  0x25   : > { %1112 = vmatprep.subr.msk.bf16.mxu0 %vm1428_vm1, %v1110_v20  ;;  %p1247_p3 = pnand %p1246_p2, %p1240_p13 }
  0x27   : > { %790 = vperm.xlu0 %1211, %v358_v26  }
  0x2c   : > { %1115 = vmatpush3.bf16.xpose.msk.msra.mxu0 %vm1428_vm1, %v1110_v20  ;;  %v350_v20 = vld [vmem:[%s1607_s5 + $0x8] sm:$0xff] }
  0x2d   : > { %1118 = vmatprep.subr.msk.bf16.mxu0 %vm1428_vm1, %v1116_v27 }
  0x34   : > { %1121 = vmatpush3.bf16.xpose.msk.msra.mxu0 %vm1428_vm1, %v1116_v27 }
  0x35   : > { %1124 = vmatprep.subr.msk.bf16.mxu0 %vm1428_vm1, %v1122_v30 }
  0x3c   : > { %1127 = vmatpush3.bf16.xpose.msk.msra.mxu0 %vm1428_vm1, %v1122_v30 }
  0x3d   : > { %1130 = vmatprep.subr.msk.bf16.mxu0 %vm1428_vm1, %v1128_v33 }
  0x44   : > { %1133 = vmatpush3.bf16.xpose.msk.msra.mxu0 %vm1428_vm1, %v1128_v33 }
  0x45   : > { %1136 = vmatprep.subr.msk.bf16.mxu0 %vm1428_vm1, %v1134_v36 }
  0x4c   : > { %1139 = vmatpush3.bf16.xpose.msk.msra.mxu0 %vm1428_vm1, %v1134_v36 }
  0x4d   : > { %1142 = vmatprep.subr.msk.bf16.mxu0 %vm1428_vm1, %v1140_v39 }
  0x54   : > { %1145 = vmatpush3.bf16.xpose.msk.msra.mxu0 %vm1428_vm1, %v1140_v39 }
  0x5b   : > { %1054 = vmatmul.mubr.msk.f32.vlgmr.msra.gmra.mrb[0].mxu0 %vm395_vm0, %v334_v40 }
  0x5c   : > { %1056 = vmatprep.mubr.msk.f32.mxu0 %vm395_vm0, %v335_v41 }
  0x5f   : > { %1057 = vmatmul.mubr.msk.f32.gmra.mrb[2].mxu0 %vm395_vm0, %v336_v42 }
  0x8e   : > { %v378_v44 = vpop.permute.xlu0 %377 }
  0x8f   : > { %v388_v45 = vpop.permute.xlu1 %387 }
  0x92   : > { %v383_v46 = vpop.permute.xlu0 %382 }
  0x93   : > { %v393_v51 = vpop.permute.xlu1 %392 }
  0x96   : > { %v548_v3 = vpop.permute.xlu0 %547 }
  0x97   : > { %v553_v2 = vpop.permute.xlu1 %552 }
  0x9a   : > { %v558_v10 = vpop.permute.xlu0 %557 }
  0x9b   : > { %v563_v8 = vpop.permute.xlu1 %562 }
  0x9e   : > { %v670_v26 = vpop.permute.xlu0 %669 }
  0x9f   : > { %v675_v25 = vpop.permute.xlu1 %674 }
  0xa2   : > { %v680_v33 = vpop.permute.xlu0 %679 }
  0xa3   : > { %v685_v31 = vpop.permute.xlu1 %684 }
 0x12e   : > { %v1055_v47 = vpop.f32.mrb[0].mxu0 }
 0x12f   : > { %v528_v48 = vadd.f32 %v1055_v47, %v383_v46  ;;  %v522_v49 = vpop.f32.mrb[1].mxu0 }
 0x130   : > { %v523_v50 = vadd.f32 %v522_v49, %v378_v44  ;;  %v791_v44 = vpop.permute.xlu0 %790 }
 0x131   : > { %1213 = vtanh.f32 %v528_v48 }
 0x132   : > { %1215 = vtanh.f32 %v523_v50  ;;  %v1058_v52 = vpop.f32.mrb[2].mxu0 }
 0x133   : > { %v538_v53 = vadd.f32 %v1058_v52, %v393_v51  ;;  %v532_v54 = vpop.f32.mrb[3].mxu0 }
 0x134   : > { %v533_v55 = vadd.f32 %v532_v54, %v388_v45 }
 0x135   : > { %1217 = vtanh.f32 %v538_v53 }
 0x136   : > { %1219 = vtanh.f32 %v533_v55 }
 0x13b   : > { %v1214_v56 = vpop.eup %1213 }
 0x13c   : > { %v1216_v57 = vpop.eup %1215 }
 0x13d   : > { %v1146_v58 = vpack.c.bf16 %v1214_v56, %v1216_v57 }
 0x13f   : > { %v1218_v59 = vpop.eup %1217  ;;  %1147 = vmatprep.subr.bf16.mxu1 %v1146_v58 }
 0x140   : > { %v1220_v60 = vpop.eup %1219  ;;  %1149 = vmatpush3.bf16.msra.mxu1 %v1146_v58 }
 0x141   : > { %v1150_v61 = vpack.c.bf16 %v1218_v59, %v1220_v60 }
 0x143   : > { %1151 = vmatprep.subr.bf16.mxu1 %v1150_v61 }
 0x144   : > { %1153 = vmatpush3.bf16.msra.mxu1 %v1150_v61 }
 0x147   : > { %1068 = vmatmul.mubr.msk.f32.vlgmr.msra.gmra.mrb[0].mxu1 %vm565_vm2, %v342_v62 }
 0x148   : > { %1070 = vmatprep.mubr.msk.f32.mxu1 %vm565_vm2, %v343_v63 }
 0x14b   : > { %1071 = vmatmul.mubr.msk.f32.gmra.mrb[2].mxu1 %vm565_vm2, %v344_v0 }
 0x14c   : > { %1081 = vmatprep.mubr.msk.f32.mxu1 %vm565_vm2, %v349_v1 }
 0x21a   : > { %v1069_v4 = vpop.f32.mrb[0].mxu1 }
 0x21b   : > { %v650_v5 = vadd.f32 %v1069_v4, %v553_v2  ;;  %v644_v6 = vpop.f32.mrb[1].mxu1 }
 0x21c   : > { %v645_v7 = vadd.f32 %v644_v6, %v548_v3 }
 0x21d   : > { %1221 = vtanh.f32 %v650_v5 }
 0x21e   : > { %1223 = vtanh.f32 %v645_v7  ;;  %v1072_v9 = vpop.f32.mrb[2].mxu1 }
 0x21f   : > { %v660_v11 = vadd.f32 %v1072_v9, %v563_v8  ;;  %v654_v12 = vpop.f32.mrb[3].mxu1 }
 0x220   : > { %v655_v13 = vadd.f32 %v654_v12, %v558_v10 }
 0x221   : > { %1225 = vtanh.f32 %v660_v11 }
 0x222   : > { %1227 = vtanh.f32 %v655_v13 }
 0x227   : > { %v1222_v14 = vpop.eup %1221 }
 0x228   : > { %v1224_v15 = vpop.eup %1223 }
 0x229   : > { %v1154_v16 = vpack.c.bf16 %v1222_v14, %v1224_v15 }
 0x22b   : > { %v1226_v17 = vpop.eup %1225  ;;  %1155 = vmatprep.subr.bf16.mxu1 %v1154_v16 }
 0x22c   : > { %v1228_v18 = vpop.eup %1227  ;;  %1157 = vmatpush3.bf16.msra.mxu1 %v1154_v16 }
 0x22d   : > { %v1158_v19 = vpack.c.bf16 %v1226_v17, %v1228_v18 }
 0x22f   : > { %1159 = vmatprep.subr.bf16.mxu1 %v1158_v19 }
 0x230   : > { %1161 = vmatpush3.bf16.msra.mxu1 %v1158_v19 }
 0x231   : > { %1162 = vmatprep.subr.bf16.mxu1 %v1302_v23 }
 0x233   : > { %1082 = vmatmul.mubr.msk.f32.vlgmr.msra.gmra.mrb[4].mxu1 %vm565_vm2, %v350_v20 }
 0x234   : > { %1084 = vmatprep.mubr.msk.f32.mxu1 %vm565_vm2, %v351_v21 }
 0x237   : > { %1085 = vmatmul.mubr.msk.f32.gmra.mrb[6].mxu1 %vm565_vm2, %v352_v22 }
 0x238   : > { %1095 = vmatprep.mubr.msk.f32.mxu1 %vm1303_vm3, %v1304_v24 }
 0x306   : > { %v1083_v27 = vpop.f32.mrb[4].mxu1 }
 0x307   : > { %v771_v28 = vadd.f32 %v1083_v27, %v675_v25  ;;  %v765_v29 = vpop.f32.mrb[5].mxu1 }
 0x308   : > { %v766_v30 = vadd.f32 %v765_v29, %v670_v26 }
 0x309   : > { %1229 = vtanh.f32 %v771_v28 }
 0x30a   : > { %1231 = vtanh.f32 %v766_v30  ;;  %v1086_v32 = vpop.f32.mrb[6].mxu1 }
 0x30b   : > { %v781_v34 = vadd.f32 %v1086_v32, %v685_v31  ;;  %v775_v35 = vpop.f32.mrb[7].mxu1 }
 0x30c   : > { %v776_v36 = vadd.f32 %v775_v35, %v680_v33 }
 0x30d   : > { %1233 = vtanh.f32 %v781_v34 }
 0x30e   : > { %1235 = vtanh.f32 %v776_v36 }
 0x313   : > { %v1230_v37 = vpop.eup %1229 }
 0x314   : > { %v1232_v38 = vpop.eup %1231 }
 0x315   : > { %v1163_v39 = vpack.c.bf16 %v1230_v37, %v1232_v38 }
 0x317   : > { %v1234_v40 = vpop.eup %1233  ;;  %1164 = vmatpush3.bf16.msra.mxu1 %v1163_v39 }
 0x318   : > { %v1236_v41 = vpop.eup %1235  ;;  %1165 = vmatprep.subr.bf16.mxu1 %v1302_v23 }
 0x319   : > { %v1166_v42 = vpack.c.bf16 %v1234_v40, %v1236_v41 }
 0x31b   : > { %1167 = vmatpush3.bf16.msra.mxu1 %v1166_v42 }
 0x31e   : > { %1096 = vmatmul.mubr.msk.f32.vlgmr.msra.gmra.mrb[8].mxu1 %vm565_vm2, %v357_v43 }
 0x3f1   : > { %v862_v45 = vpop.f32.mrb[8].mxu1 }
 0x3f2   : > { %v863_v46 = vadd.f32 %v862_v45, %v791_v44  ;;  %v1097_v47 = vpop.f32.mrb[9].mxu1 }
 0x3f4   : > { %866 = vst [vmem:[%s326_s23] sm:$0x3] %v863_v46 }
 0x3f5   : > { %1250 = shalt.err (!%p1247_p3)
}
 0x3f6   : > { %s1251_s16 = scalar_lea.hbm %s1560_s21, 32  ;;  %s1255_s23 = scalar_lea.hbm %s1611_s9, 64 }
 0x3f7   : > { %p1252_p4 = scmp.ne.s32.totalorder %s1560_s21, %s1251_s16  ;;  %p1256_p9 = scmp.lt.u32.totalorder %s1560_s21, %s1611_s9 }
 0x3f8   : > { %p1257_p10 = scmp.lt.u32.totalorder %s1255_s23, %s1251_s16  ;;  %p1259_p12 = scmp.lt.u32.totalorder %s1251_s16, %s1560_s21 }
 0x3f9   : > { %p1253_p7 = pnand %p1252_p4, %p1394_p5 }
 0x3fa   : > { %p1258_p11 = por %p1257_p10, %p1256_p9 }
 0x3fb   : > { %p1254_p8 = pneg %p1253_p7 }
 0x3fc   : > { %p1260_p13 = por %p1259_p12, %p1258_p11 }
 0x3fe   : > { %p1261_p0 = pnand %p1260_p13, %p1254_p8 }
 0x400   : > { %1264 = shalt.err (!%p1261_p0)
}
 0x401   : > { %1168 = dma.vmem_to_hbm [thread:$0]  (%p1394_p5), %s1562_s24, 32, %s1560_s21, %s868_s27  }
 0x402 PF: > { %p1174_p1 = scmp.ge.s32.totalorder %s1299_s12, 2  ;;  %s893_s28 = sand.u32 1, %s1287_s30  }
 0x403   : > { %s894_s13 = scalar_lea.sflag [#allocation3], %s893_s28 }
 0x404   : > { %p1171_p2 = pnand %p1174_p1, %p1398_p6 }
 0x406   : > { %1282 = dma.done.wait (!%p1171_p2), %s894_s13, 32  }
 0x407   : > { %1284 = vsyncadd (!%p1171_p2), %s894_s13, 4294967264  ;;  %p19_p3 = scmp.ge.s32.totalorder %s1381_s15, 4   ;;  %s1616_s30 = smov %s1291_s10 }
 0x408   : > { %s1617_s10 = smov %s1295_s11  ;;  %s1618_s11 = smov %s1392_s18 }
 0x409   : > { %s1619_s12 = smov %s1381_s15  ;;  %21 = sbr.rel (!%p19_p3) target bundleno = 3 (0x3), region = 91 }
 0x410   :  { %899 = vsyncpa [#allocation3], 1 }
 0x411   :  { %901 = vsyncpa [#allocation3 + $0x1], 1 }

</bundles_post_ra>
